<compile_context>
chip_gen: v7x
topology: tpu7x:2x2x1
jax: 0.10.0
libtpu: 0.0.40
codegen_flags: <defaults>
</compile_context>

<pallas_src>
import functools

import jax
import jax.numpy as jnp
from jax import lax
from jax.experimental import pallas as pl
from jax.experimental.pallas import tpu as pltpu


def _round_up(n: int, m: int) -> int:
    return ((n + m - 1) // m) * m


def _round_down(n: int, m: int) -> int:
    return (n // m) * m


def _sublane_rows(dtype) -> int:
    # Rows per packed sublane tile: 8 for 32-bit, 16 for 16-bit, 32 for 8-bit.
    return max(8, 32 // jnp.dtype(dtype).itemsize)


def _rmsnorm_kernel(x_ref, w_ref, o_ref, *, eps):
    """One (tm, H) slab of tokens; full feature dim per block.

    x_ref: (tm, H) activations
    w_ref: (1, H)  scale parameter (broadcast over rows)
    o_ref: (tm, H) output (dtype = promote(x.dtype, weight.dtype))
    """
    x = x_ref[...]
    # mean(x^2) in f32.  The f32 cast is recomputed below instead of keeping a
    # (tm, H) f32 temporary live across the cross-lane reduction (VMEM saver;
    # the extra VPU cast is free slack on a mem-bound kernel).
    ms = jnp.mean(jnp.square(x.astype(jnp.float32)), axis=-1, keepdims=True)
    inv = lax.rsqrt(ms + eps)                                     # EUP rsqrt
    normed = (x.astype(jnp.float32) * inv).astype(x.dtype)        # .type_as(x)
    # weight * normed: jnp promotion mirrors torch (f32 weight promotes).
    o_ref[...] = (w_ref[...] * normed).astype(o_ref.dtype)


def rms_norm_pallas(x, weight, *, eps: float = 1e-5,
                    target_block_bytes: int = 4 << 20):
    """x: (..., H). weight: (H,). Returns promote_types(x.dtype, weight.dtype)."""
    orig_shape = x.shape
    H = orig_shape[-1]
    M = 1
    for d in orig_shape[:-1]:
        M *= d
    x2d = x.reshape(M, H)
    w2d = weight.reshape(1, H)

    out_dtype = jnp.result_type(x.dtype, weight.dtype)

    sub = _sublane_rows(x.dtype)
    row_bytes = H * jnp.dtype(x.dtype).itemsize

    # Token slab: ~target_block_bytes of input per block, dtype-packing aligned.
    tm = max(sub, _round_up(max(1, target_block_bytes // row_bytes), sub))
    # Keep >= 4 grid steps when there are enough rows (2 TCs x 2 steps on v7x).
    if M >= 4 * sub:
        tm = min(tm, max(sub, _round_down(M // 4, sub)))
    # Never bigger than the (sublane-rounded) row count.
    tm = min(tm, _round_up(M, sub))

    grid = (pl.cdiv(M, tm),)

    # VMEM accounting: 2x input block + 2x output block (double buffering)
    # + f32 temporaries in the body + resident weight + margin, clamped so it
    # is always safe on v7x's 64 MiB/TC.
    blk_in = tm * H * jnp.dtype(x.dtype).itemsize
    blk_out = tm * H * jnp.dtype(out_dtype).itemsize
    vmem_est = 2 * blk_in + 2 * blk_out + 3 * tm * H * 4 + 2 * H * 4 + (2 << 20)
    vmem_limit = int(min(max(vmem_est, 32 << 20), 48 << 20))

    out = pl.pallas_call(
        functools.partial(_rmsnorm_kernel, eps=eps),
        out_shape=jax.ShapeDtypeStruct((M, H), out_dtype),
        grid_spec=pltpu.PrefetchScalarGridSpec(
            num_scalar_prefetch=0,
            grid=grid,
            in_specs=[
                pl.BlockSpec((tm, H), lambda i: (i, 0)),   # token slab
                pl.BlockSpec((1, H), lambda i: (0, 0)),    # weight (resident)
            ],
            out_specs=pl.BlockSpec((tm, H), lambda i: (i, 0)),
        ),
        compiler_params=pltpu.CompilerParams(
            dimension_semantics=("parallel",),   # splits steps across TCs on v7x
            vmem_limit_bytes=vmem_limit,
        ),
    )(x2d, w2d)

    return out.reshape(orig_shape)


def rms_norm_ref(x, weight, eps=1e-5):
    xf = x.astype(jnp.float32)
    normed = xf * lax.rsqrt(jnp.mean(xf * xf, axis=-1, keepdims=True) + eps)
    return weight * normed.astype(x.dtype)   # promotes like torch


if __name__ == "__main__":
    key = jax.random.PRNGKey(0)
    kx1, kx2, kx3, kw = jax.random.split(key, 4)

    hidden = 128  # lane-dense feature width (multiple of 128)
    # nn.Parameter(torch.ones(dim)) with a perturbation so the scale path is exercised.
    weight = jnp.ones((hidden,), dtype=jnp.float32) + 0.1 * jax.random.normal(
        kw, (hidden,), dtype=jnp.float32)

    # 1) Small, evenly tiled f32 case (batch=2, seq=8, hidden=128).
    x1 = jax.random.normal(kx1, (2, 8, hidden), dtype=jnp.float32)
    y1 = rms_norm_pallas(x1, weight, eps=1e-5)
    jax.block_until_ready(y1)
    assert y1.shape == x1.shape and y1.dtype == jnp.float32
    assert jnp.allclose(y1, rms_norm_ref(x1, weight), atol=1e-5, rtol=1e-5)

    # 2) Ragged token count (exercises the partial tail block, no pad/slice).
    x2 = jax.random.normal(kx2, (3, 37, hidden), dtype=jnp.float32)
    y2 = rms_norm_pallas(x2, weight, eps=1e-5)
    jax.block_until_ready(y2)
    assert y2.shape == x2.shape
    assert jnp.allclose(y2, rms_norm_ref(x2, weight), atol=1e-5, rtol=1e-5)

    # 3) bf16 activations (sublane-16 packing; torch-style promotion to f32).
    x3 = jax.random.normal(kx3, (2, 8, hidden), dtype=jnp.bfloat16)
    y3 = rms_norm_pallas(x3, weight, eps=1e-5)
    jax.block_until_ready(y3)
    assert y3.shape == x3.shape and y3.dtype == jnp.float32
    assert jnp.allclose(y3, rms_norm_ref(x3, weight), atol=1e-2, rtol=1e-2)

    print("KERNEL_OK")
</pallas_src>

<mosaic_0001>
module attributes {stable_mosaic.version = 11 : i64} {
  func.func @_rmsnorm_kernel(%arg0: i32, %arg1: memref<16x128xf32, #tpu.memory_space<vmem>>, %arg2: memref<1x128xf32, #tpu.memory_space<vmem>>, %arg3: memref<16x128xf32, #tpu.memory_space<vmem>>) attributes {dimension_semantics = [#tpu.dimension_semantics<parallel>], iteration_bounds = array<i64: 1>, scalar_prefetch = 0 : i64, scratch_operands = 0 : i64, tpu.core_type = #tpu.core_type<tc>, window_params = [{transform_indices = @transform_0, window_bounds = array<i64: 16, 128>}, {pipeline_mode = #tpu.pipeline_mode<synchronous>, transform_indices = @transform_1, window_bounds = array<i64: 1, 128>}, {transform_indices = @transform_2, window_bounds = array<i64: 16, 128>}]} {
    %c0 = arith.constant 0 : index
    %c0_0 = arith.constant 0 : index
    %0 = vector.load %arg1[%c0, %c0_0] : memref<16x128xf32, #tpu.memory_space<vmem>>, vector<16x128xf32>
    %1 = arith.mulf %0, %0 : vector<16x128xf32>
    %cst = arith.constant dense<0.000000e+00> : vector<16xf32>
    %2 = vector.multi_reduction <add>, %1, %cst [1] : vector<16x128xf32> to vector<16xf32>
    %3 = vector.shape_cast %2 : vector<16xf32> to vector<16x1xf32>
    %cst_1 = arith.constant 1.280000e+02 : f32
    %4 = vector.broadcast %cst_1 : f32 to vector<16x1xf32>
    %5 = arith.divf %3, %4 : vector<16x1xf32>
    %cst_2 = arith.constant 9.99999974E-6 : f32
    %6 = vector.broadcast %cst_2 : f32 to vector<16x1xf32>
    %7 = arith.addf %5, %6 : vector<16x1xf32>
    %8 = math.rsqrt %7 : vector<16x1xf32>
    %9 = vector.broadcast %8 : vector<16x1xf32> to vector<16x128xf32>
    %10 = arith.mulf %0, %9 : vector<16x128xf32>
    %c0_3 = arith.constant 0 : index
    %c0_4 = arith.constant 0 : index
    %11 = vector.load %arg2[%c0_3, %c0_4] : memref<1x128xf32, #tpu.memory_space<vmem>>, vector<1x128xf32>
    %12 = vector.broadcast %11 : vector<1x128xf32> to vector<16x128xf32>
    %13 = arith.mulf %12, %10 : vector<16x128xf32>
    %c0_5 = arith.constant 0 : index
    %c0_6 = arith.constant 0 : index
    %14 = vector.load %arg3[%c0_5, %c0_6] : memref<16x128xf32, #tpu.memory_space<vmem>>, vector<16x128xf32>
    tpu.vector_store %arg3[%c0_5, %c0_6], %13 {strides = array<i32>} : memref<16x128xf32, #tpu.memory_space<vmem>>, vector<16x128xf32>,
    return
  }
  func.func @transform_0(%arg0: i32) -> (i32, i32) {
    %c0_i32 = arith.constant 0 : i32
    %c0_i32_0 = arith.constant 0 : i32
    return %arg0, %c0_i32 : i32, i32
  }
  func.func @transform_1(%arg0: i32) -> (i32, i32) {
    %c0_i32 = arith.constant 0 : i32
    %c0_i32_0 = arith.constant 0 : i32
    %c0_i32_1 = arith.constant 0 : i32
    return %c0_i32, %c0_i32_0 : i32, i32
  }
  func.func @transform_2(%arg0: i32) -> (i32, i32) {
    %c0_i32 = arith.constant 0 : i32
    %c0_i32_0 = arith.constant 0 : i32
    return %arg0, %c0_i32 : i32, i32
  }
}

</mosaic_0001>

<bundles_post_ra>
// kernel: tpu_custom_call.1
= control target key start
LH: loop header
LB: loop body
LE: loop exit
PB: predicated region body
PF: predicated region fallthrough
CT: control target
= control target key end

     0   :  { %7 = vsyncpa [#allocation3], 0  ;;  %s180_s0 = inlined_call_operand.hbm [shape: f32[16,128], index: 0, kind: input, shape index: {}]   ;;  %s181_s1 = inlined_call_operand.vmem [shape: f32[1,128], index: 1, kind: input, shape index: {}]   ;;  %s182_s2 = inlined_call_operand.hbm [shape: f32[16,128], index: 2, kind: output, shape index: {}]  }
   0x1   :  { %8 = vsyncpa [#allocation4], 0  ;;  %s128_s9 = smov [#allocation2]   ;;  %s80_s13 = scalar_lea.hbm %s180_s0, 256 }
   0x2   :  { %s14_s10 = sshll.u32 %s128_s9, 4  ;;  %p81_p0 = scmp.ne.s32.totalorder %s180_s0, %s80_s13  ;;  %s15_s10 = int_to_ptr.vmem [resolvable:$true] %s14_s10 }
   0x3   :  { %p84_p1 = scmp.lt.u32.totalorder %s80_s13, %s180_s0 }
   0x5   :  { %p86_p2 = pnand %p84_p1, %p81_p0 }
   0x7   :  { %89 = shalt.err (!%p86_p2)
}
   0x8   :  { %s90_s18 = scalar_lea.vmem %s15_s10, 256  ;;  %p95_p4 = scmp.lt.s32.totalorder %s15_s10, %s15_s10 }
   0x9   :  { %p91_p3 = scmp.ne.s32.totalorder %s15_s10, %s90_s18  ;;  %p96_p5 = scmp.lt.s32.totalorder %s90_s18, %s90_s18 }
   0xb   :  { %p97_p6 = por %p96_p5, %p95_p4 }
   0xd   :  { %p98_p7 = pnand %p97_p6, %p91_p3 }
   0xf   :  { %101 = shalt.err (!%p98_p7)
}
  0x10   :  { %s129_s19 = smov 128   ;;  %s130_s20 = smov 8  }
  0x11   :  { %20 = dma.hbm_to_vmem [thread:$0]  %s180_s0, 256, %s15_s10, [#allocation3], %s129_s19, %s129_s19, %s130_s20  }
  0x12   :  { %124 = dma.done.wait [#allocation3], 256  }
  0x13   :  { %125 = vsyncadd [#allocation3], 4294967040  ;;  %v26_v0 = vld [vmem:[#allocation2] sm:$0xff]  ;;  %v27_v1 = vld [vmem:[#allocation2 + $0x8] sm:$0xff]  ;;  %s131_s0 = smov [#allocation5]  }
  0x14   :  { %v28_v2 = vmul.f32 %v26_v0, %v26_v0  ;;  %v29_v3 = vmul.f32 %v27_v1, %v27_v1  ;;  %v71_v11 = vld [vmem:[%s181_s1] ss:$0 sm:$0xff]  ;;  %s59_s25 = sshll.u32 %s131_s0, 4  ;;  %s60_s25 = int_to_ptr.vmem [resolvable:$true] %s59_s25 }
  0x15   :  { %s102_s26 = scalar_lea.vmem %s60_s25, 256  ;;  %p107_p9 = scmp.lt.s32.totalorder %s60_s25, %s60_s25 }
  0x16   :  { %30 = vadd.xlane.f32.xlu0 %v28_v2  ;;  %p103_p8 = scmp.ne.s32.totalorder %s60_s25, %s102_s26  ;;  %p108_p10 = scmp.lt.s32.totalorder %s102_s26, %s102_s26 }
  0x18   :  { %p109_p11 = por %p108_p10, %p107_p9 }
  0x1a   :  { %32 = vadd.xlane.f32.xlu0 %v29_v3  ;;  %p110_p12 = pnand %p109_p11, %p103_p8 }
  0xa3   :  { %v31_v4 = vpop.xlane.xlu0 %30 }
  0xa4   :  { %v35_v5 = vmul.f32 0.0078125, %v31_v4 }
  0xa6   :  { %v37_v6 = vadd.f32 1e-05, %v35_v5 }
  0xa7   :  { %v33_v7 = vpop.xlane.xlu0 %32 }
  0xa8   :  { %76 = vrsqrt.f32 %v37_v6  ;;  %v36_v8 = vmul.f32 0.0078125, %v33_v7 }
  0xaa   :  { %v38_v9 = vadd.f32 1e-05, %v36_v8 }
  0xac   :  { %78 = vrsqrt.f32 %v38_v9 }
  0xb2   :  { %v77_v10 = vpop.eup %76 }
  0xb3   :  { %v41_v12 = vmul.f32 %v77_v10, %v26_v0 }
  0xb5   :  { %v50_v13 = vmul.f32 %v71_v11, %v41_v12 }
  0xb6   :  { %v79_v14 = vpop.eup %78 }
  0xb7   :  { %v42_v15 = vmul.f32 %v79_v14, %v27_v1  ;;  %52 = vst [vmem:[#allocation5] sm:$0xff] %v50_v13 }
  0xb9   :  { %v51_v16 = vmul.f32 %v71_v11, %v42_v15 }
  0xbb   :  { %53 = vst [vmem:[#allocation5 + $0x8] sm:$0xff] %v51_v16 }
  0xbc   :  { %113 = shalt.err (!%p110_p12)
}
  0xbd   :  { %s114_s1 = scalar_lea.hbm %s182_s2, 256 }
  0xbe   :  { %p115_p13 = scmp.ne.s32.totalorder %s182_s2, %s114_s1  ;;  %p118_p0 = scmp.lt.u32.totalorder %s114_s1, %s182_s2 }
  0xc0   :  { %p120_p1 = pnand %p118_p0, %p115_p13 }
  0xc2   :  { %123 = shalt.err (!%p120_p1)
}
  0xc3   :  { %65 = dma.vmem_to_hbm [thread:$0]  %s60_s25, 256, %s182_s2, [#allocation4], %s129_s19, %s129_s19, %s130_s20  }
  0xc4   :  { %126 = dma.done.wait [#allocation4], 256  }
  0xc5   :  { %127 = vsyncadd [#allocation4], 4294967040 }
  0xc6   :  { %69 = vsyncpa [#allocation3], 1 }
  0xc7   :  { %70 = vsyncpa [#allocation4], 1 }

</bundles_post_ra>
